<compile_context>
chip_gen: v6e
topology: v6e:2x2x1
jax: 0.10.0
libtpu: 0.0.40
codegen_flags: <defaults>
</compile_context>

<pallas_src>
import functools

import jax
import jax.numpy as jnp
from jax import lax
from jax.experimental import pallas as pl
from jax.experimental.pallas import tpu as pltpu

LANE = 128
SUB = 8


def _lrn_kernel(x_ref, o_ref, *, size, scale, beta, k):
    # x_ref / o_ref: (C, TH, 128) block in the input dtype.
    C = x_ref.shape[0]
    pad_lo = size // 2
    pad_hi = (size - 1) // 2

    # x^2 in f32 is the only full-block value kept live across the loop
    # (x itself is re-read per channel in the epilogue to keep VMEM/vreg
    # pressure low for narrow dtypes).
    x2 = x_ref[...].astype(jnp.float32)
    x2 = x2 * x2

    for c in range(C):
        # Cross-channel window sum with implicit zero padding: clamp the
        # channel range instead of materializing a padded buffer.
        lo = max(0, c - pad_lo)
        hi = min(C, c + pad_hi + 1)
        acc = x2[lo]
        for j in range(lo + 1, hi):
            acc = acc + x2[j]

        # denom = (sum/size * alpha + k) ** beta, with scale = alpha/size
        # folded at compile time.
        base = acc * scale + k
        if beta == 0.75:
            r = lax.rsqrt(base)       # base^-1/2  (EUP)
            inv = r * jnp.sqrt(r)     # base^-3/4  (EUP + one VPU mul, no divide)
        elif beta == 0.5:
            inv = lax.rsqrt(base)
        else:
            inv = jnp.power(base, -beta)   # generic path for arbitrary beta

        # Re-read this channel of x (cast per-use) and store the output tile
        # exactly once -> single store pass over the whole block.
        xc = x_ref[c].astype(jnp.float32)
        o_ref[c] = (xc * inv).astype(o_ref.dtype)


def lrn2d(x, size, alpha=0.0001, beta=0.75, k=1.0, *, block_bytes=4 * 1024 * 1024):
    """x: (N, C, H, W) -> (N, C, H, W), LRN across channels (PyTorch Lrn2d)."""
    N, C, H, W = x.shape
    HW = H * W
    itemsize = jnp.dtype(x.dtype).itemsize

    # Lane-dense spatial layout: (N, C, HW) -> (N, C, s_rows, 128).
    # Pad only when HW is not already a lane multiple (pad + trailing slice are
    # whole extra HBM passes around a memory-bound kernel, so skip when we can).
    s_rows = pl.cdiv(HW, LANE)
    hw_pad = s_rows * LANE

    x_flat = x.reshape(N, C, HW)
    if hw_pad != HW:
        x_flat = jnp.pad(x_flat, ((0, 0), (0, 0), (0, hw_pad - HW)))
    x4 = x_flat.reshape(N, C, s_rows, LANE)

    # Sublane-tile height per block from the byte budget (HBM-bound kernel ->
    # big lane-dense blocks), multiple of 8.
    bytes_per_row = C * LANE * itemsize
    th = max(SUB, (block_bytes // bytes_per_row) // SUB * SUB)

    # Keep at least ~8 grid steps (when the problem has that much work) so the
    # DMA/compute pipeline and megacore sharding have something to overlap;
    # per-step cost is only ~0.35 us.
    MIN_STEPS = 8

    def _steps(t):
        return N * pl.cdiv(s_rows, t)

    while th > SUB and _steps(th) < MIN_STEPS:
        th = max(SUB, (th // 2) // SUB * SUB)

    if th >= s_rows:
        # Full-extent block on the sublane axis: any size is a legal block dim.
        th = s_rows
        grid_s = 1
    else:
        # Last spatial block may be partially out of bounds: reads of the tail
        # are don't-care (purely elementwise over spatial) and OOB writes are
        # masked by Pallas.
        grid_s = pl.cdiv(s_rows, th)

    grid = (N, grid_s)

    # VMEM budget derived from live buffers: double-buffered input + output
    # blocks plus f32 temporaries (x^2 and epilogue temps) and headroom;
    # capped well inside v7x's 64 MiB physical VMEM.
    blk_bytes = C * th * LANE * itemsize
    blk_f32 = C * th * LANE * 4
    vmem_limit = 2 * blk_bytes + 2 * blk_bytes + 3 * blk_f32 + (4 << 20)
    vmem_limit = int(min(max(vmem_limit, 32 << 20), 48 << 20))

    # TODO(synk): very large channel counts (blocks near the VMEM limit even at
    # th=8) would need a halo-blocked channel axis; practical LRN uses fit.

    kernel = functools.partial(
        _lrn_kernel,
        size=int(size),
        scale=float(alpha) / float(size),   # alpha/size folded at compile time
        beta=float(beta),
        k=float(k),
    )

    y4 = pl.pallas_call(
        kernel,
        out_shape=jax.ShapeDtypeStruct((N, C, s_rows, LANE), x.dtype),
        grid=grid,
        in_specs=[pl.BlockSpec((None, C, th, LANE), lambda n, s: (n, 0, s, 0))],
        out_specs=pl.BlockSpec((None, C, th, LANE), lambda n, s: (n, 0, s, 0)),
        compiler_params=pltpu.CompilerParams(
            dimension_semantics=("parallel", "parallel"),
            vmem_limit_bytes=vmem_limit,
        ),
    )(x4)

    y = y4.reshape(N, C, hw_pad)
    if hw_pad != HW:
        y = y[:, :, :HW]
    return y.reshape(N, C, H, W)


def _lrn2d_reference(x, size, alpha=0.0001, beta=0.75, k=1.0):
    # Pure-JAX reference mirroring the PyTorch module exactly.
    N, C, H, W = x.shape
    xf = x.reshape(N, C, H * W)
    x2 = xf * xf
    pad_lo = size // 2
    pad_hi = (size - 1) // 2
    x2p = jnp.pad(x2, ((0, 0), (pad_lo, pad_hi), (0, 0)))
    acc = sum(x2p[:, i:i + C, :] for i in range(size))
    div = acc / size
    denom = jnp.power(div * alpha + k, beta)
    return (xf / denom).reshape(N, C, H, W)


if __name__ == "__main__":
    key = jax.random.PRNGKey(0)

    # Case 1: module-typical shapes, default hyperparameters (rsqrt epilogue),
    # H*W lane-aligned -> no host-side pad/slice at all.
    N, C, H, W = 2, 4, 16, 16
    size = 5
    x = jax.random.normal(key, (N, C, H, W), dtype=jnp.float32)
    y = jax.block_until_ready(lrn2d(x, size=size, alpha=0.0001, beta=0.75, k=1.0))
    y_ref = _lrn2d_reference(x, size=size, alpha=0.0001, beta=0.75, k=1.0)
    assert y.shape == (N, C, H, W)
    assert jnp.allclose(y, y_ref, atol=1e-5, rtol=1e-5), "mismatch vs reference (case 1)"

    # Case 2: ragged spatial size + generic-beta path (exercises lane padding + pow).
    N2, C2, H2, W2 = 1, 6, 7, 7
    x2 = jax.random.normal(jax.random.PRNGKey(1), (N2, C2, H2, W2), dtype=jnp.float32)
    y2 = jax.block_until_ready(lrn2d(x2, size=3, alpha=0.001, beta=0.6, k=2.0))
    y2_ref = _lrn2d_reference(x2, size=3, alpha=0.001, beta=0.6, k=2.0)
    assert y2.shape == (N2, C2, H2, W2)
    assert jnp.allclose(y2, y2_ref, atol=1e-5, rtol=1e-5), "mismatch vs reference (case 2)"

    # Case 3: larger spatial extent -> multi-step spatial grid with a partially
    # out-of-bounds last block (exercises the masked-tail path).
    N3, C3, H3, W3 = 1, 3, 37, 37
    x3 = jax.random.normal(jax.random.PRNGKey(2), (N3, C3, H3, W3), dtype=jnp.float32)
    y3 = jax.block_until_ready(lrn2d(x3, size=5, alpha=0.0001, beta=0.75, k=1.0))
    y3_ref = _lrn2d_reference(x3, size=5, alpha=0.0001, beta=0.75, k=1.0)
    assert y3.shape == (N3, C3, H3, W3)
    assert jnp.allclose(y3, y3_ref, atol=1e-5, rtol=1e-5), "mismatch vs reference (case 3)"

    print("KERNEL_OK")
</pallas_src>

<mosaic_0001>
module attributes {stable_mosaic.version = 11 : i64} {
  func.func @_lrn_kernel(%arg0: i32, %arg1: i32, %arg2: memref<1x4x2x128xf32, #tpu.memory_space<vmem>>, %arg3: memref<1x4x2x128xf32, #tpu.memory_space<vmem>>) attributes {dimension_semantics = [#tpu.dimension_semantics<parallel>, #tpu.dimension_semantics<parallel>], iteration_bounds = array<i64: 2, 1>, scalar_prefetch = 0 : i64, scratch_operands = 0 : i64, tpu.core_type = #tpu.core_type<tc>, window_params = [{transform_indices = @transform_0, window_bounds = array<i64: 1, 4, 2, 128>}, {transform_indices = @transform_1, window_bounds = array<i64: 1, 4, 2, 128>}]} {
    %c0 = arith.constant 0 : index
    %c0_0 = arith.constant 0 : index
    %c0_1 = arith.constant 0 : index
    %c0_2 = arith.constant 0 : index
    %0 = vector.load %arg2[%c0, %c0_0, %c0_1, %c0_2] : memref<1x4x2x128xf32, #tpu.memory_space<vmem>>, vector<1x4x2x128xf32>
    %1 = vector.shape_cast %0 : vector<1x4x2x128xf32> to vector<4x2x128xf32>
    %2 = arith.mulf %1, %1 : vector<4x2x128xf32>
    %3 = vector.extract_strided_slice %2 {offsets = [0, 0, 0], sizes = [1, 2, 128], strides = [1, 1, 1]} : vector<4x2x128xf32> to vector<1x2x128xf32>
    %4 = vector.shape_cast %3 : vector<1x2x128xf32> to vector<2x128xf32>
    %5 = vector.extract_strided_slice %2 {offsets = [1, 0, 0], sizes = [1, 2, 128], strides = [1, 1, 1]} : vector<4x2x128xf32> to vector<1x2x128xf32>
    %6 = vector.shape_cast %5 : vector<1x2x128xf32> to vector<2x128xf32>
    %7 = arith.addf %4, %6 : vector<2x128xf32>
    %8 = vector.extract_strided_slice %2 {offsets = [2, 0, 0], sizes = [1, 2, 128], strides = [1, 1, 1]} : vector<4x2x128xf32> to vector<1x2x128xf32>
    %9 = vector.shape_cast %8 : vector<1x2x128xf32> to vector<2x128xf32>
    %10 = arith.addf %7, %9 : vector<2x128xf32>
    %cst = arith.constant 2.000000e-05 : f32
    %11 = vector.broadcast %cst : f32 to vector<2x128xf32>
    %12 = arith.mulf %10, %11 : vector<2x128xf32>
    %cst_3 = arith.constant 1.000000e+00 : f32
    %13 = vector.broadcast %cst_3 : f32 to vector<2x128xf32>
    %14 = arith.addf %12, %13 : vector<2x128xf32>
    %15 = math.rsqrt %14 : vector<2x128xf32>
    %16 = math.sqrt %15 : vector<2x128xf32>
    %17 = arith.mulf %15, %16 : vector<2x128xf32>
    %c0_4 = arith.constant 0 : index
    %c0_5 = arith.constant 0 : index
    %c0_6 = arith.constant 0 : index
    %c0_7 = arith.constant 0 : index
    %18 = vector.load %arg2[%c0_4, %c0_5, %c0_6, %c0_7] : memref<1x4x2x128xf32, #tpu.memory_space<vmem>>, vector<1x1x2x128xf32>
    %19 = vector.shape_cast %18 : vector<1x1x2x128xf32> to vector<2x128xf32>
    %20 = arith.mulf %19, %17 : vector<2x128xf32>
    %c0_8 = arith.constant 0 : index
    %c0_9 = arith.constant 0 : index
    %c0_10 = arith.constant 0 : index
    %c0_11 = arith.constant 0 : index
    %21 = vector.load %arg3[%c0_8, %c0_9, %c0_10, %c0_11] : memref<1x4x2x128xf32, #tpu.memory_space<vmem>>, vector<1x1x2x128xf32>
    %22 = vector.shape_cast %21 : vector<1x1x2x128xf32> to vector<2x128xf32>
    %23 = vector.shape_cast %20 : vector<2x128xf32> to vector<1x1x2x128xf32>
    tpu.vector_store %arg3[%c0_8, %c0_9, %c0_10, %c0_11], %23 {strides = array<i32>} : memref<1x4x2x128xf32, #tpu.memory_space<vmem>>, vector<1x1x2x128xf32>,
    %24 = vector.extract_strided_slice %2 {offsets = [0, 0, 0], sizes = [1, 2, 128], strides = [1, 1, 1]} : vector<4x2x128xf32> to vector<1x2x128xf32>
    %25 = vector.shape_cast %24 : vector<1x2x128xf32> to vector<2x128xf32>
    %26 = vector.extract_strided_slice %2 {offsets = [1, 0, 0], sizes = [1, 2, 128], strides = [1, 1, 1]} : vector<4x2x128xf32> to vector<1x2x128xf32>
    %27 = vector.shape_cast %26 : vector<1x2x128xf32> to vector<2x128xf32>
    %28 = arith.addf %25, %27 : vector<2x128xf32>
    %29 = vector.extract_strided_slice %2 {offsets = [2, 0, 0], sizes = [1, 2, 128], strides = [1, 1, 1]} : vector<4x2x128xf32> to vector<1x2x128xf32>
    %30 = vector.shape_cast %29 : vector<1x2x128xf32> to vector<2x128xf32>
    %31 = arith.addf %28, %30 : vector<2x128xf32>
    %32 = vector.extract_strided_slice %2 {offsets = [3, 0, 0], sizes = [1, 2, 128], strides = [1, 1, 1]} : vector<4x2x128xf32> to vector<1x2x128xf32>
    %33 = vector.shape_cast %32 : vector<1x2x128xf32> to vector<2x128xf32>
    %34 = arith.addf %31, %33 : vector<2x128xf32>
    %cst_12 = arith.constant 2.000000e-05 : f32
    %35 = vector.broadcast %cst_12 : f32 to vector<2x128xf32>
    %36 = arith.mulf %34, %35 : vector<2x128xf32>
    %cst_13 = arith.constant 1.000000e+00 : f32
    %37 = vector.broadcast %cst_13 : f32 to vector<2x128xf32>
    %38 = arith.addf %36, %37 : vector<2x128xf32>
    %39 = math.rsqrt %38 : vector<2x128xf32>
    %40 = math.sqrt %39 : vector<2x128xf32>
    %41 = arith.mulf %39, %40 : vector<2x128xf32>
    %c0_14 = arith.constant 0 : index
    %c1 = arith.constant 1 : index
    %c0_15 = arith.constant 0 : index
    %c0_16 = arith.constant 0 : index
    %42 = vector.load %arg2[%c0_14, %c1, %c0_15, %c0_16] : memref<1x4x2x128xf32, #tpu.memory_space<vmem>>, vector<1x1x2x128xf32>
    %43 = vector.shape_cast %42 : vector<1x1x2x128xf32> to vector<2x128xf32>
    %44 = arith.mulf %43, %41 : vector<2x128xf32>
    %c0_17 = arith.constant 0 : index
    %c1_18 = arith.constant 1 : index
    %c0_19 = arith.constant 0 : index
    %c0_20 = arith.constant 0 : index
    %45 = vector.load %arg3[%c0_17, %c1_18, %c0_19, %c0_20] : memref<1x4x2x128xf32, #tpu.memory_space<vmem>>, vector<1x1x2x128xf32>
    %46 = vector.shape_cast %45 : vector<1x1x2x128xf32> to vector<2x128xf32>
    %47 = vector.shape_cast %44 : vector<2x128xf32> to vector<1x1x2x128xf32>
    tpu.vector_store %arg3[%c0_17, %c1_18, %c0_19, %c0_20], %47 {strides = array<i32>} : memref<1x4x2x128xf32, #tpu.memory_space<vmem>>, vector<1x1x2x128xf32>,
    %48 = vector.extract_strided_slice %2 {offsets = [0, 0, 0], sizes = [1, 2, 128], strides = [1, 1, 1]} : vector<4x2x128xf32> to vector<1x2x128xf32>
    %49 = vector.shape_cast %48 : vector<1x2x128xf32> to vector<2x128xf32>
    %50 = vector.extract_strided_slice %2 {offsets = [1, 0, 0], sizes = [1, 2, 128], strides = [1, 1, 1]} : vector<4x2x128xf32> to vector<1x2x128xf32>
    %51 = vector.shape_cast %50 : vector<1x2x128xf32> to vector<2x128xf32>
    %52 = arith.addf %49, %51 : vector<2x128xf32>
    %53 = vector.extract_strided_slice %2 {offsets = [2, 0, 0], sizes = [1, 2, 128], strides = [1, 1, 1]} : vector<4x2x128xf32> to vector<1x2x128xf32>
    %54 = vector.shape_cast %53 : vector<1x2x128xf32> to vector<2x128xf32>
    %55 = arith.addf %52, %54 : vector<2x128xf32>
    %56 = vector.extract_strided_slice %2 {offsets = [3, 0, 0], sizes = [1, 2, 128], strides = [1, 1, 1]} : vector<4x2x128xf32> to vector<1x2x128xf32>
    %57 = vector.shape_cast %56 : vector<1x2x128xf32> to vector<2x128xf32>
    %58 = arith.addf %55, %57 : vector<2x128xf32>
    %cst_21 = arith.constant 2.000000e-05 : f32
    %59 = vector.broadcast %cst_21 : f32 to vector<2x128xf32>
    %60 = arith.mulf %58, %59 : vector<2x128xf32>
    %cst_22 = arith.constant 1.000000e+00 : f32
    %61 = vector.broadcast %cst_22 : f32 to vector<2x128xf32>
    %62 = arith.addf %60, %61 : vector<2x128xf32>
    %63 = math.rsqrt %62 : vector<2x128xf32>
    %64 = math.sqrt %63 : vector<2x128xf32>
    %65 = arith.mulf %63, %64 : vector<2x128xf32>
    %c0_23 = arith.constant 0 : index
    %c2 = arith.constant 2 : index
    %c0_24 = arith.constant 0 : index
    %c0_25 = arith.constant 0 : index
    %66 = vector.load %arg2[%c0_23, %c2, %c0_24, %c0_25] : memref<1x4x2x128xf32, #tpu.memory_space<vmem>>, vector<1x1x2x128xf32>
    %67 = vector.shape_cast %66 : vector<1x1x2x128xf32> to vector<2x128xf32>
    %68 = arith.mulf %67, %65 : vector<2x128xf32>
    %c0_26 = arith.constant 0 : index
    %c2_27 = arith.constant 2 : index
    %c0_28 = arith.constant 0 : index
    %c0_29 = arith.constant 0 : index
    %69 = vector.load %arg3[%c0_26, %c2_27, %c0_28, %c0_29] : memref<1x4x2x128xf32, #tpu.memory_space<vmem>>, vector<1x1x2x128xf32>
    %70 = vector.shape_cast %69 : vector<1x1x2x128xf32> to vector<2x128xf32>
    %71 = vector.shape_cast %68 : vector<2x128xf32> to vector<1x1x2x128xf32>
    tpu.vector_store %arg3[%c0_26, %c2_27, %c0_28, %c0_29], %71 {strides = array<i32>} : memref<1x4x2x128xf32, #tpu.memory_space<vmem>>, vector<1x1x2x128xf32>,
    %72 = vector.extract_strided_slice %2 {offsets = [1, 0, 0], sizes = [1, 2, 128], strides = [1, 1, 1]} : vector<4x2x128xf32> to vector<1x2x128xf32>
    %73 = vector.shape_cast %72 : vector<1x2x128xf32> to vector<2x128xf32>
    %74 = vector.extract_strided_slice %2 {offsets = [2, 0, 0], sizes = [1, 2, 128], strides = [1, 1, 1]} : vector<4x2x128xf32> to vector<1x2x128xf32>
    %75 = vector.shape_cast %74 : vector<1x2x128xf32> to vector<2x128xf32>
    %76 = arith.addf %73, %75 : vector<2x128xf32>
    %77 = vector.extract_strided_slice %2 {offsets = [3, 0, 0], sizes = [1, 2, 128], strides = [1, 1, 1]} : vector<4x2x128xf32> to vector<1x2x128xf32>
    %78 = vector.shape_cast %77 : vector<1x2x128xf32> to vector<2x128xf32>
    %79 = arith.addf %76, %78 : vector<2x128xf32>
    %cst_30 = arith.constant 2.000000e-05 : f32
    %80 = vector.broadcast %cst_30 : f32 to vector<2x128xf32>
    %81 = arith.mulf %79, %80 : vector<2x128xf32>
    %cst_31 = arith.constant 1.000000e+00 : f32
    %82 = vector.broadcast %cst_31 : f32 to vector<2x128xf32>
    %83 = arith.addf %81, %82 : vector<2x128xf32>
    %84 = math.rsqrt %83 : vector<2x128xf32>
    %85 = math.sqrt %84 : vector<2x128xf32>
    %86 = arith.mulf %84, %85 : vector<2x128xf32>
    %c0_32 = arith.constant 0 : index
    %c3 = arith.constant 3 : index
    %c0_33 = arith.constant 0 : index
    %c0_34 = arith.constant 0 : index
    %87 = vector.load %arg2[%c0_32, %c3, %c0_33, %c0_34] : memref<1x4x2x128xf32, #tpu.memory_space<vmem>>, vector<1x1x2x128xf32>
    %88 = vector.shape_cast %87 : vector<1x1x2x128xf32> to vector<2x128xf32>
    %89 = arith.mulf %88, %86 : vector<2x128xf32>
    %c0_35 = arith.constant 0 : index
    %c3_36 = arith.constant 3 : index
    %c0_37 = arith.constant 0 : index
    %c0_38 = arith.constant 0 : index
    %90 = vector.load %arg3[%c0_35, %c3_36, %c0_37, %c0_38] : memref<1x4x2x128xf32, #tpu.memory_space<vmem>>, vector<1x1x2x128xf32>
    %91 = vector.shape_cast %90 : vector<1x1x2x128xf32> to vector<2x128xf32>
    %92 = vector.shape_cast %89 : vector<2x128xf32> to vector<1x1x2x128xf32>
    tpu.vector_store %arg3[%c0_35, %c3_36, %c0_37, %c0_38], %92 {strides = array<i32>} : memref<1x4x2x128xf32, #tpu.memory_space<vmem>>, vector<1x1x2x128xf32>,
    return
  }
  func.func @transform_0(%arg0: i32, %arg1: i32) -> (i32, i32, i32, i32) {
    %c0_i32 = arith.constant 0 : i32
    %c0_i32_0 = arith.constant 0 : i32
    %c0_i32_1 = arith.constant 0 : i32
    return %arg0, %c0_i32, %arg1, %c0_i32_0 : i32, i32, i32, i32
  }
  func.func @transform_1(%arg0: i32, %arg1: i32) -> (i32, i32, i32, i32) {
    %c0_i32 = arith.constant 0 : i32
    %c0_i32_0 = arith.constant 0 : i32
    %c0_i32_1 = arith.constant 0 : i32
    return %arg0, %c0_i32, %arg1, %c0_i32_0 : i32, i32, i32, i32
  }
}

</mosaic_0001>

<bundles_post_ra>
// kernel: tpu_custom_call.1
= control target key start
LH: loop header
LB: loop body
LE: loop exit
PB: predicated region body
PF: predicated region fallthrough
CT: control target
= control target key end

     0   :  { %6 = vsyncpa [#allocation3], 0  ;;  %s703_s0 = inlined_call_operand.hbm [shape: f32[2,4,2,128], index: 0, kind: input, shape index: {}]   ;;  %s704_s1 = inlined_call_operand.hbm [shape: f32[2,4,2,128], index: 1, kind: output, shape index: {}]  }
   0x1   :  { %8 = vsyncpa [#allocation3 + $0x1], 0 }
   0x2   :  { %9 = vsyncpa [#allocation4], 0 }
   0x3   :  { %11 = vsyncpa [#allocation4 + $0x1], 0  ;;  %s543_s6 = smov 0   ;;  %s545_s7 = smov 0  }
   0x4   :  { %s547_s8 = smov 0   ;;  %s549_s9 = smov 0  }
   0x5   :  { %s551_s10 = smov 0   ;;  %s553_s11 = smov 0  }
   0x6 LB: > { %s316_s12 = sadd.s32 4294967295, %s525_s11   ;;  %s317_s13 = sadd.s32 4294967294, %s525_s11   ;;  %s525_s11 = sphi %s553_s11, %s17_s11   ;;  %s521_s10 = sphi %s551_s10, %s715_s10   ;;  %s517_s9 = sphi %s549_s9, %s714_s9   ;;  %s513_s8 = sphi %s547_s8, %s713_s8   ;;  %s509_s7 = sphi %s545_s7, %s712_s7   ;;  %s505_s6 = sphi %s543_s6, %s711_s6  }
   0x7   : > { %s29_s14 = sadd.s32 1, %s521_s10  ;;  %s38_s15 = sadd.s32 1, %s513_s8 }
   0x8   : > { %p31_p0 = scmp.ge.s32.totalorder %s29_s14, 2  ;;  %p45_p1 = scmp.ne.s32.totalorder %s513_s8, %s509_s7 }
   0x9   : > { %p46_p2 = scmp.eq.s32.totalorder %s525_s11, 0  ;;  %p51_p3 = scmp.ne.s32.totalorder %s509_s7, %s505_s6 }
   0xa   : > { %s717_s14 = smov (%p31_p0, %s29_s14), 0  ;;  %p52_p5 = scmp.eq.s32.totalorder %s316_s12, 0 }
   0xb   : > { %p584_p4 = por %p46_p2, %p45_p1  ;;  %s33_s17 = ssub.s32 %s521_s10, %s717_s14 }
   0xc   : > { %p77_p6 = scmp.eq.s32.totalorder %s316_s12, 1  ;;  %p36_p7 = scmp.eq.s32.totalorder %s33_s17, 0 }
   0xd   : > { %p590_p8 = por %p52_p5, %p51_p3  ;;  %p83_p10 = scmp.eq.s32.totalorder %s317_s13, 1 }
   0xe   : > { %p594_p9 = por %p77_p6, %p45_p1  ;;  %p351_p13 = scmp.lt.s32.totalorder %s525_s11, 2 }
   0xf   : > { %s599_s20 = scalar_select %p36_p7, %s513_s8, %s38_s15  }
  0x10   : > { %p601_p11 = por %p83_p10, %p51_p3  ;;  %s103_s22 = sand.u32 1, %s513_s8  }
  0x11   : > { %s320_s23 = sshll.u32 %s103_s22, 3  ;;  %s337_s24 = sshll.u32 %s521_s10, 7 }
  0x12   : > { %s114_s27 = scalar_lea.hbm %s703_s0, %s337_s24  ;;  %s107_s28 = scalar_lea.vmem [#allocation2], %s320_s23 }
  0x13   : > { %s115_s29 = sshll.u32 %s107_s28, 4  ;;  %p614_p0 = pnand %p351_p13, %p584_p4  ;;  %s116_s29 = int_to_ptr.vmem [resolvable:$true] %s115_s29 }
  0x14   : > { %p323_p1 = scmp.ge.s32.totalorder %s525_s11, 1  ;;  %s104_s2 = scalar_lea.sflag [#allocation3], %s103_s22 }
  0x15   : > { %p419_p2 = pneg %p614_p0  ;;  %s430_s3 = scalar_lea.vmem %s116_s29, 128 }
  0x16   : > { %p431_p3 = scmp.ne.s32.totalorder %s116_s29, %s430_s3  ;;  %s527_s4 = smov [#allocation2]  }
  0x17   : > { %s435_s5 = sshll.u32 %s527_s4, 4  ;;  %s436_s5 = int_to_ptr.vmem [resolvable:$false] %s435_s5 }
  0x18   : > { %p433_p5 = pnand %p431_p3, %p419_p2  ;;  %s437_s12 = scalar_lea.vmem %s436_s5, 256 }
  0x19   : > { %p438_p7 = scmp.lt.s32.totalorder %s116_s29, %s436_s5  ;;  %p439_p10 = scmp.lt.s32.totalorder %s437_s12, %s430_s3 }
  0x1a   : > { %p434_p6 = pneg %p433_p5 }
  0x1b   : > { %p440_p12 = por %p439_p10, %p438_p7 }
  0x1d   : > { %p441_p4 = pnand %p440_p12, %p434_p6 }
  0x1f   : > { %444 = shalt.err (!%p441_p4)
}
  0x20   : > { %s528_s13 = smov 32   ;;  %s529_s15 = smov 2  }
  0x21   : > { %346 = dma.hbm_to_vmem [thread:$0]  (!%p614_p0), %s114_s27, 128, %s116_s29, %s104_s2, %s528_s13, %s528_s13, %s529_s15  }
  0x22   : > { %p123_p13 = scmp.lt.s32.totalorder %s525_s11, 3 }
  0x24   : > { %p124_p2 = pnand %p323_p1, %p123_p13 }
  0x25   : > { %s627_s16 = sand.u32 (!%p124_p2), 1, %s509_s7  }
  0x26   : > { %127 = sbr.rel (%p124_p2) target bundleno = 107 (0x6b), region = 24  ;;  %s324_s17 = sshll.u32 (!%p124_p2), %s627_s16, 3 }
  0x27   : > { %s130_s22 = scalar_lea.sflag (!%p124_p2), [#allocation3], %s627_s16  ;;  %s633_s23 = scalar_lea.vmem (!%p124_p2), [#allocation2], %s324_s17 }
  0x2b   : > { %496 = dma.done.wait (%p590_p8), %s130_s22, 128  }
  0x2c   : > { %498 = vsyncadd (%p590_p8), %s130_s22, 4294967168  ;;  %v152_v0 = vld [vmem:[%s633_s23] sm:$0x3]  ;;  %v153_v1 = vld [vmem:[%s633_s23 + $0x2] sm:$0x3]  ;;  %s151_s18 = scalar_lea.vmem [#allocation5], %s324_s17 }
  0x2d   : > { %v154_v2 = vld [vmem:[%s633_s23 + $0x4] sm:$0x3]  ;;  %v156_v3 = vmul.f32 %v152_v0, %v152_v0  ;;  %v157_v4 = vmul.f32 %v153_v1, %v153_v1  ;;  %v155_v6 = vld [vmem:[%s633_s23 + $0x6] sm:$0x3]  ;;  %v173_v33 = vld [vmem:[%s633_s23] sm:$0x3] }
  0x2e   : > { %v158_v5 = vmul.f32 %v154_v2, %v154_v2  ;;  %v159_v7 = vmul.f32 %v155_v6, %v155_v6  ;;  %s231_s24 = sshll.u32 %s151_s18, 4  ;;  %v330_v38 = vld [vmem:[%s633_s23 + $0x6] sm:$0x3]  ;;  %s338_s25 = sshll.u32 %s517_s9, 7  ;;  %v326_v40 = vld [vmem:[%s633_s23 + $0x2] sm:$0x3]  ;;  %s650_s24 = int_to_ptr.vmem [resolvable:$true] %s231_s24 }
  0x2f   : > { %v160_v8 = vadd.f32 %v157_v4, %v156_v3  ;;  %v328_v41 = vld [vmem:[%s633_s23 + $0x4] sm:$0x3]  ;;  %s655_s28 = scalar_lea.hbm %s704_s1, %s338_s25  ;;  %s217_s9 = scalar_lea.sflag [#allocation4], %s627_s16 }
  0x30   : > { %v198_v9 = vadd.f32 %v158_v5, %v157_v4  ;;  %s445_s29 = scalar_lea.vmem %s650_s24, 128  ;;  %s530_s30 = smov [#allocation5]  }
  0x31   : > { %v161_v10 = vadd.f32 %v160_v8, %v158_v5  ;;  %p446_p8 = scmp.ne.s32.totalorder %s650_s24, %s445_s29  ;;  %s449_s2 = sshll.u32 %s530_s30, 4  ;;  %s450_s2 = int_to_ptr.vmem [resolvable:$false] %s449_s2 }
  0x32   : > { %v199_v11 = vadd.f32 %v198_v9, %v159_v7  ;;  %s451_s3 = scalar_lea.vmem %s450_s2, 256  ;;  %p452_p1 = scmp.lt.s32.totalorder %s650_s24, %s450_s2 }
  0x33   : > { %v162_v12 = vmul.f32 2e-05, %v161_v10  ;;  %v176_v13 = vadd.f32 %v161_v10, %v159_v7  ;;  %p447_p12 = pnand %p446_p8, %p594_p9  ;;  %p453_p3 = scmp.lt.s32.totalorder %s451_s3, %s445_s29 }
  0x34   : > { %v200_v14 = vmul.f32 2e-05, %v199_v11 }
  0x35   : > { %v163_v15 = vadd.f32 1.0, %v162_v12  ;;  %v177_v16 = vmul.f32 2e-05, %v176_v13  ;;  %p448_p0 = pneg %p447_p12  ;;  %p454_p5 = por %p453_p3, %p452_p1 }
  0x36   : > { %v201_v17 = vadd.f32 1.0, %v200_v14 }
  0x37   : > { %405 = vrsqrt.f32 %v163_v15  ;;  %v178_v18 = vadd.f32 1.0, %v177_v16  ;;  %p455_p6 = pnand %p454_p5, %p448_p0 }
  0x38   : > { %407 = vrsqrt.f32 %v201_v17 }
  0x39   : > { %409 = vrsqrt.f32 %v178_v18 }
  0x44   : > { %v406_v19 = vpop.eup %405 }
  0x45   : > { %v408_v20 = vpop.eup %407  ;;  %411 = vrsqrt.f32 %v406_v19  ;;  %vm167_vm0 = vcmp.eq.f32.partialorder %v406_v19, inf  ;;  %v170_v23 = vand.u32 2147483648, %v406_v19  ;;  %vm169_vm1 = vcmp.eq.f32.partialorder %v406_v19, 0.0 }
  0x46   : > { %v410_v21 = vpop.eup %409  ;;  %413 = vrsqrt.f32 %v408_v20  ;;  %vm205_vm2 = vcmp.eq.f32.partialorder %v408_v20, inf  ;;  %v208_v26 = vand.u32 2147483648, %v408_v20  ;;  %vm207_vm4 = vcmp.eq.f32.partialorder %v408_v20, 0.0 }
  0x47   : > { %415 = vrsqrt.f32 %v410_v21  ;;  %vm182_vm3 = vcmp.eq.f32.partialorder %v410_v21, inf  ;;  %v185_v28 = vand.u32 2147483648, %v410_v21  ;;  %vm184_vm5 = vcmp.eq.f32.partialorder %v410_v21, 0.0 }
  0x52   : > { %v412_v22 = vpop.eup %411 }
  0x53   : > { %v414_v24 = vpop.eup %413  ;;  %v166_v25 = vmul.f32 %v412_v22, %v406_v19 }
  0x54   : > { %v416_v27 = vpop.eup %415  ;;  %v204_v29 = vmul.f32 %v414_v24, %v408_v20 }
  0x55   : > { %v168_v30 = vsel %vm167_vm0, %v406_v19, %v166_v25  ;;  %v181_v31 = vmul.f32 %v416_v27, %v410_v21 }
  0x56   : > { %v171_v32 = vsel %vm169_vm1, %v170_v23, %v168_v30  ;;  %v206_v34 = vsel %vm205_vm2, %v408_v20, %v204_v29 }
  0x57   : > { %v172_v35 = vmul.f32 %v406_v19, %v171_v32  ;;  %v183_v36 = vsel %vm182_vm3, %v410_v21, %v181_v31  ;;  %v209_v37 = vsel %vm207_vm4, %v208_v26, %v206_v34 }
  0x58   : > { %v186_v39 = vsel %vm184_vm5, %v185_v28, %v183_v36  ;;  %v210_v42 = vmul.f32 %v408_v20, %v209_v37 }
  0x59   : > { %v174_v43 = vmul.f32 %v173_v33, %v172_v35  ;;  %v187_v44 = vmul.f32 %v410_v21, %v186_v39 }
  0x5a   : > { %v213_v45 = vmul.f32 %v330_v38, %v210_v42 }
  0x5b   : > { %175 = vst [vmem:[%s151_s18] sm:$0x3] %v174_v43  ;;  %v190_v46 = vmul.f32 %v326_v40, %v187_v44  ;;  %v195_v47 = vmul.f32 %v328_v41, %v187_v44 }
  0x5c   : > { %331 = vst [vmem:[%s151_s18 + $0x6] sm:$0x3] %v213_v45 }
  0x5d   : > { %327 = vst [vmem:[%s151_s18 + $0x2] sm:$0x3] %v190_v46  ;;  %329 = vst [vmem:[%s151_s18 + $0x4] sm:$0x3] %v195_v47 }
  0x5e   : > { %458 = shalt.err (!%p455_p6)
}
  0x5f   : > { %s459_s4 = scalar_lea.hbm %s655_s28, 128  ;;  %s463_s13 = scalar_lea.hbm %s704_s1, 256 }
  0x60   : > { %p460_p7 = scmp.ne.s32.totalorder %s655_s28, %s459_s4  ;;  %p464_p13 = scmp.lt.s32.totalorder %s655_s28, %s704_s1 }
  0x61   : > { %p465_p2 = scmp.lt.s32.totalorder %s463_s13, %s459_s4 }
  0x62   : > { %p461_p10 = pnand %p460_p7, %p594_p9 }
  0x63   : > { %p466_p8 = por %p465_p2, %p464_p13 }
  0x64   : > { %p462_p4 = pneg %p461_p10 }
  0x66   : > { %p467_p12 = pnand %p466_p8, %p462_p4 }
  0x68   : > { %470 = shalt.err (!%p467_p12)
}
  0x69   : > { %s531_s22 = smov 32   ;;  %s532_s23 = smov 2  }
  0x6a   : > { %341 = dma.vmem_to_hbm [thread:$0]  (%p594_p9), %s650_s24, 128, %s655_s28, %s217_s9, %s531_s22, %s531_s22, %s532_s23  }
  0x6b PF: > { %s246_s18 = sand.u32 1, %s505_s6   ;;  %p710_p0 = scmp.ge.s32.totalorder %s525_s11, 2 }
  0x6c   : > { %s247_s25 = scalar_lea.sflag [#allocation4], %s246_s18 }
  0x6d   : > { %p348_p1 = pnand %p710_p0, %p601_p11 }
  0x6f   : > { %p349_p3 = pneg %p348_p1 }
  0x71   : > { %500 = dma.done.wait (%p349_p3), %s247_s25, 128  }
  0x72   : > { %502 = vsyncadd (%p349_p3), %s247_s25, 4294967168  ;;  %s17_s11 = sadd.s32 1, %s525_s11   ;;  %s711_s6 = smov %s509_s7 }
  0x73   : > { %p14_p5 = scmp.ge.s32.totalorder %s17_s11, 4   ;;  %s712_s7 = smov %s513_s8 }
  0x74   : > { %s713_s8 = smov %s599_s20  ;;  %s714_s9 = smov %s521_s10 }
  0x75   : > { %s715_s10 = smov %s717_s14  ;;  %16 = sbr.rel (!%p14_p5) target bundleno = 6 (0x6), region = 75 }
  0x7a   :  { %252 = vsyncpa [#allocation3], 1 }
  0x7b   :  { %254 = vsyncpa [#allocation3 + $0x1], 1 }
  0x7c   :  { %255 = vsyncpa [#allocation4], 1 }
  0x7d   :  { %257 = vsyncpa [#allocation4 + $0x1], 1 }

</bundles_post_ra>
